<compile_context>
chip_gen: v6e
topology: v6e:2x2x1
jax: 0.10.0
libtpu: 0.0.40
codegen_flags: <defaults>
</compile_context>

<pallas_src>
import functools

import jax
import jax.numpy as jnp
from jax.experimental import pallas as pl
from jax.experimental.pallas import tpu as pltpu

EPS = 1e-5  # PyTorch BatchNorm1d default eps


def mlp_kernel(x_ref, w1_ref, b1_ref, w2_ref, b2_ref, w3_ref, b3_ref, out_ref):
    # x: [3, TB] bf16 (features on sublanes, batch on lanes). One cast to f32.
    x = x_ref[...].astype(jnp.float32)
    w1 = w1_ref[...]  # [32, 3] f32

    # fc1 (+folded bn1) + relu on the VPU: 3 sublane/lane-broadcast FMAs.
    # Keeps the saturated MXU (vex) slot free; elementwise stays f32 for v5e.
    h1 = b1_ref[...] + w1[:, 0:1] * x[0:1, :]
    h1 = h1 + w1[:, 1:2] * x[1:2, :]
    h1 = h1 + w1[:, 2:3] * x[2:3, :]
    h1 = jnp.maximum(h1, 0.0)
    # dropout(p=0.1): identity in eval mode.

    # fc2 (+folded bn2) + relu: bf16 MXU operands, f32 accumulation.
    h2 = jnp.dot(w2_ref[...], h1.astype(jnp.bfloat16),
                 preferred_element_type=jnp.float32) + b2_ref[...]
    h2 = jnp.maximum(h2, 0.0)

    # fc3: bf16 MXU operands, f32 accumulation.
    out_ref[...] = jnp.dot(w3_ref[...], h2.astype(jnp.bfloat16),
                           preferred_element_type=jnp.float32) + b3_ref[...]


def _round_up(x, m):
    return ((x + m - 1) // m) * m


def fold_params(p):
    """Fold BatchNorm1d (eval, running stats) + linear bias into each layer.

    W' = diag(g / sqrt(v + eps)) @ W ;  b' = (b - m) * g / sqrt(v + eps) + beta
    fc1 weights stay f32 (VPU path); fc2/fc3 weights are stored bf16 for the
    MXU.  Biases become (out, 1) f32 columns (broadcast over lanes).
    """
    s1 = p["g1"] / jnp.sqrt(p["v1"] + EPS)                       # [32]
    w1f = (p["w1"] * s1[:, None]).astype(jnp.float32)            # [32, 3]  f32
    b1f = ((p["b1"] - p["m1"]) * s1 + p["be1"])[:, None]         # [32, 1]  f32
    s2 = p["g2"] / jnp.sqrt(p["v2"] + EPS)                       # [16]
    w2f = (p["w2"] * s2[:, None]).astype(jnp.bfloat16)           # [16, 32] bf16
    b2f = ((p["b2"] - p["m2"]) * s2 + p["be2"])[:, None]         # [16, 1]  f32
    w3f = p["w3"].astype(jnp.bfloat16)                           # [2, 16]  bf16
    b3f = p["b3"][:, None]                                       # [2, 1]   f32
    return w1f, b1f, w2f, b2f, w3f, b3f


def mlp_forward_t(xt, params, tile_b=32768):
    """Feature-major core: xt [3, Bp] bf16 (Bp % 128 == 0) -> logits [2, Bp] f32."""
    F, b_pad = xt.shape
    assert F == 3 and b_pad % 128 == 0

    w1f, b1f, w2f, b2f, w3f, b3f = fold_params(params)

    tb = min(max(128, _round_up(tile_b, 128)), b_pad)  # lane-aligned tile
    grid = (pl.cdiv(b_pad, tb),)                       # last block may be ragged
    const = lambda i: (0, 0)  # params fetched once, VMEM-resident across steps

    flops = 2 * b_pad * (3 * 32 + 32 * 16 + 16 * 2)
    bytes_accessed = b_pad * (3 * 2 + 2 * 4) + 4 * (32 * 3 + 32 + 16 + 2) + 2 * (16 * 32 + 2 * 16)

    return pl.pallas_call(
        mlp_kernel,
        out_shape=jax.ShapeDtypeStruct((2, b_pad), jnp.float32),
        grid=grid,
        in_specs=[
            pl.BlockSpec((F, tb), lambda i: (0, i)),   # x tile, lane-dense
            pl.BlockSpec(w1f.shape, const),
            pl.BlockSpec(b1f.shape, const),
            pl.BlockSpec(w2f.shape, const),
            pl.BlockSpec(b2f.shape, const),
            pl.BlockSpec(w3f.shape, const),
            pl.BlockSpec(b3f.shape, const),
        ],
        out_specs=pl.BlockSpec((2, tb), lambda i: (0, i)),
        compiler_params=pltpu.CompilerParams(
            dimension_semantics=("parallel",),
            vmem_limit_bytes=48 * 1024 * 1024,  # safe on v5e/v6e (128 MiB) and v7x (64 MiB/TC)
        ),
        cost_estimate=pl.CostEstimate(
            flops=flops, transcendentals=0, bytes_accessed=bytes_accessed),
    )(xt, w1f, b1f, w2f, b2f, w3f, b3f)


@functools.partial(jax.jit, static_argnames=("tile_b",))
def mlp_forward(x, params, tile_b=32768):
    """Sample-major convenience wrapper: x [B, 3] f32 -> logits [B, 2] f32."""
    B, F = x.shape
    assert F == 3
    # Pad the batch only to a multiple of 128 (<=127 wasted samples) and fuse
    # transpose + pad + bf16 cast into a single pass under jit.
    b_pad = _round_up(B, 128)
    xt = jnp.zeros((F, b_pad), jnp.bfloat16).at[:, :B].set(x.T.astype(jnp.bfloat16))
    out_t = mlp_forward_t(xt, params, tile_b=tile_b)
    return out_t[:, :B].T


def init_params(key):
    """Deterministic params mirroring the PyTorch module's shapes.

    nn.Linear(in, out): weight (out, in), bias (out,), uniform(+-1/sqrt(in)).
    BatchNorm1d: gamma=1, beta=0; running mean/var get small deterministic
    perturbations so the BN math is actually exercised.
    """
    ks = jax.random.split(key, 8)

    def linear(kw, kb, fan_in, fan_out):
        bound = 1.0 / jnp.sqrt(jnp.float32(fan_in))
        w = jax.random.uniform(kw, (fan_out, fan_in), jnp.float32, -bound, bound)
        b = jax.random.uniform(kb, (fan_out,), jnp.float32, -bound, bound)
        return w, b

    w1, b1 = linear(ks[0], ks[1], 3, 32)
    w2, b2 = linear(ks[2], ks[3], 32, 16)
    w3, b3 = linear(ks[4], ks[5], 16, 2)

    m1 = 0.1 * jax.random.normal(ks[6], (32,), jnp.float32)
    v1 = 1.0 + 0.05 * jnp.arange(32, dtype=jnp.float32)
    m2 = 0.1 * jax.random.normal(ks[7], (16,), jnp.float32)
    v2 = 1.0 + 0.05 * jnp.arange(16, dtype=jnp.float32)

    return dict(
        w1=w1, b1=b1, g1=jnp.ones((32,), jnp.float32), be1=jnp.zeros((32,), jnp.float32),
        m1=m1, v1=v1,
        w2=w2, b2=b2, g2=jnp.ones((16,), jnp.float32), be2=jnp.zeros((16,), jnp.float32),
        m2=m2, v2=v2,
        w3=w3, b3=b3,
    )


def reference_forward(x, p):
    """Pure-JAX f32 reference of the same eval-mode forward (unfolded BN)."""
    h = x @ p["w1"].T + p["b1"]
    h = (h - p["m1"]) * (p["g1"] / jnp.sqrt(p["v1"] + EPS)) + p["be1"]
    h = jnp.maximum(h, 0.0)
    h = h @ p["w2"].T + p["b2"]
    h = (h - p["m2"]) * (p["g2"] / jnp.sqrt(p["v2"] + EPS)) + p["be2"]
    h = jnp.maximum(h, 0.0)
    return h @ p["w3"].T + p["b3"]


if __name__ == "__main__":
    key = jax.random.PRNGKey(0)
    kx, kx2, kp = jax.random.split(key, 3)
    params = init_params(kp)

    # bf16 MXU operands -> loosened tolerance vs the f32 reference.
    ATOL = RTOL = 3e-2

    # Small canonical test (B=8).
    B = 8
    x = jax.random.normal(kx, (B, 3), jnp.float32)
    out = jax.block_until_ready(mlp_forward(x, params))
    ref = reference_forward(x, params)
    assert out.shape == (B, 2)
    assert jnp.allclose(out, ref, atol=ATOL, rtol=RTOL), "mismatch vs reference (B=8)"

    # Exercise the batch grid with a ragged last block:
    # B=300 -> b_pad=384, tile_b=256 -> grid=2, last block hangs off the edge.
    B2 = 300
    x2 = jax.random.normal(kx2, (B2, 3), jnp.float32)
    out2 = jax.block_until_ready(mlp_forward(x2, params, tile_b=256))
    ref2 = reference_forward(x2, params)
    assert out2.shape == (B2, 2)
    assert jnp.allclose(out2, ref2, atol=ATOL, rtol=RTOL), "mismatch vs reference (B=300)"

    print("KERNEL_OK")
</pallas_src>

<mosaic_0001>
module attributes {stable_mosaic.version = 11 : i64} {
  func.func @mlp_kernel(%arg0: i32, %arg1: memref<3x128xbf16, #tpu.memory_space<vmem>>, %arg2: memref<32x3xf32, #tpu.memory_space<vmem>>, %arg3: memref<32x1xf32, #tpu.memory_space<vmem>>, %arg4: memref<16x32xbf16, #tpu.memory_space<vmem>>, %arg5: memref<16x1xf32, #tpu.memory_space<vmem>>, %arg6: memref<2x16xbf16, #tpu.memory_space<vmem>>, %arg7: memref<2x1xf32, #tpu.memory_space<vmem>>, %arg8: memref<2x128xf32, #tpu.memory_space<vmem>>) attributes {dimension_semantics = [#tpu.dimension_semantics<parallel>], iteration_bounds = array<i64: 1>, scalar_prefetch = 0 : i64, scratch_operands = 0 : i64, tpu.core_type = #tpu.core_type<tc>, window_params = [{transform_indices = @transform_0, window_bounds = array<i64: 3, 128>}, {pipeline_mode = #tpu.pipeline_mode<synchronous>, transform_indices = @transform_1, window_bounds = array<i64: 32, 3>}, {pipeline_mode = #tpu.pipeline_mode<synchronous>, transform_indices = @transform_2, window_bounds = array<i64: 32, 1>}, {pipeline_mode = #tpu.pipeline_mode<synchronous>, transform_indices = @transform_3, window_bounds = array<i64: 16, 32>}, {pipeline_mode = #tpu.pipeline_mode<synchronous>, transform_indices = @transform_4, window_bounds = array<i64: 16, 1>}, {pipeline_mode = #tpu.pipeline_mode<synchronous>, transform_indices = @transform_5, window_bounds = array<i64: 2, 16>}, {pipeline_mode = #tpu.pipeline_mode<synchronous>, transform_indices = @transform_6, window_bounds = array<i64: 2, 1>}, {transform_indices = @transform_7, window_bounds = array<i64: 2, 128>}]} {
    %c0 = arith.constant 0 : index
    %c0_0 = arith.constant 0 : index
    %0 = vector.load %arg1[%c0, %c0_0] : memref<3x128xbf16, #tpu.memory_space<vmem>>, vector<3x128xbf16>
    %1 = arith.extf %0 : vector<3x128xbf16> to vector<3x128xf32>
    %c0_1 = arith.constant 0 : index
    %c0_2 = arith.constant 0 : index
    %2 = vector.load %arg2[%c0_1, %c0_2] : memref<32x3xf32, #tpu.memory_space<vmem>>, vector<32x3xf32>
    %c0_3 = arith.constant 0 : index
    %c0_4 = arith.constant 0 : index
    %3 = vector.load %arg3[%c0_3, %c0_4] : memref<32x1xf32, #tpu.memory_space<vmem>>, vector<32x1xf32>
    %4 = vector.extract_strided_slice %2 {offsets = [0, 0], sizes = [32, 1], strides = [1, 1]} : vector<32x3xf32> to vector<32x1xf32>
    %5 = vector.extract_strided_slice %1 {offsets = [0, 0], sizes = [1, 128], strides = [1, 1]} : vector<3x128xf32> to vector<1x128xf32>
    %6 = vector.broadcast %4 : vector<32x1xf32> to vector<32x128xf32>
    %7 = vector.broadcast %5 : vector<1x128xf32> to vector<32x128xf32>
    %8 = arith.mulf %6, %7 : vector<32x128xf32>
    %9 = vector.broadcast %3 : vector<32x1xf32> to vector<32x128xf32>
    %10 = arith.addf %9, %8 : vector<32x128xf32>
    %11 = vector.extract_strided_slice %2 {offsets = [0, 1], sizes = [32, 1], strides = [1, 1]} : vector<32x3xf32> to vector<32x1xf32>
    %12 = vector.extract_strided_slice %1 {offsets = [1, 0], sizes = [1, 128], strides = [1, 1]} : vector<3x128xf32> to vector<1x128xf32>
    %13 = vector.broadcast %11 : vector<32x1xf32> to vector<32x128xf32>
    %14 = vector.broadcast %12 : vector<1x128xf32> to vector<32x128xf32>
    %15 = arith.mulf %13, %14 : vector<32x128xf32>
    %16 = arith.addf %10, %15 : vector<32x128xf32>
    %17 = vector.extract_strided_slice %2 {offsets = [0, 2], sizes = [32, 1], strides = [1, 1]} : vector<32x3xf32> to vector<32x1xf32>
    %18 = vector.extract_strided_slice %1 {offsets = [2, 0], sizes = [1, 128], strides = [1, 1]} : vector<3x128xf32> to vector<1x128xf32>
    %19 = vector.broadcast %17 : vector<32x1xf32> to vector<32x128xf32>
    %20 = vector.broadcast %18 : vector<1x128xf32> to vector<32x128xf32>
    %21 = arith.mulf %19, %20 : vector<32x128xf32>
    %22 = arith.addf %16, %21 : vector<32x128xf32>
    %cst = arith.constant 0.000000e+00 : f32
    %23 = vector.broadcast %cst : f32 to vector<32x128xf32>
    %24 = arith.maximumf %22, %23 : vector<32x128xf32>
    %c0_5 = arith.constant 0 : index
    %c0_6 = arith.constant 0 : index
    %25 = vector.load %arg4[%c0_5, %c0_6] : memref<16x32xbf16, #tpu.memory_space<vmem>>, vector<16x32xbf16>
    %26 = arith.truncf %24 : vector<32x128xf32> to vector<32x128xbf16>
    %cst_7 = arith.constant dense<0.000000e+00> : vector<16x128xf32>
    %27 = tpu.matmul %25, %26, %cst_7 {dimension_numbers = #tpu.dot_dimension_numbers<[1], [0], [0], [1], [0, 0, 1, 1], [], []>} : vector<16x32xbf16>, vector<32x128xbf16>, vector<16x128xf32> -> vector<16x128xf32>
    %c0_8 = arith.constant 0 : index
    %c0_9 = arith.constant 0 : index
    %28 = vector.load %arg5[%c0_8, %c0_9] : memref<16x1xf32, #tpu.memory_space<vmem>>, vector<16x1xf32>
    %29 = vector.broadcast %28 : vector<16x1xf32> to vector<16x128xf32>
    %30 = arith.addf %27, %29 : vector<16x128xf32>
    %cst_10 = arith.constant 0.000000e+00 : f32
    %31 = vector.broadcast %cst_10 : f32 to vector<16x128xf32>
    %32 = arith.maximumf %30, %31 : vector<16x128xf32>
    %c0_11 = arith.constant 0 : index
    %c0_12 = arith.constant 0 : index
    %33 = vector.load %arg6[%c0_11, %c0_12] : memref<2x16xbf16, #tpu.memory_space<vmem>>, vector<2x16xbf16>
    %34 = arith.truncf %32 : vector<16x128xf32> to vector<16x128xbf16>
    %cst_13 = arith.constant dense<0.000000e+00> : vector<2x128xf32>
    %35 = tpu.matmul %33, %34, %cst_13 {dimension_numbers = #tpu.dot_dimension_numbers<[1], [0], [0], [1], [0, 0, 1, 1], [], []>} : vector<2x16xbf16>, vector<16x128xbf16>, vector<2x128xf32> -> vector<2x128xf32>
    %c0_14 = arith.constant 0 : index
    %c0_15 = arith.constant 0 : index
    %36 = vector.load %arg7[%c0_14, %c0_15] : memref<2x1xf32, #tpu.memory_space<vmem>>, vector<2x1xf32>
    %37 = vector.broadcast %36 : vector<2x1xf32> to vector<2x128xf32>
    %38 = arith.addf %35, %37 : vector<2x128xf32>
    %c0_16 = arith.constant 0 : index
    %c0_17 = arith.constant 0 : index
    %39 = vector.load %arg8[%c0_16, %c0_17] : memref<2x128xf32, #tpu.memory_space<vmem>>, vector<2x128xf32>
    tpu.vector_store %arg8[%c0_16, %c0_17], %38 {strides = array<i32>} : memref<2x128xf32, #tpu.memory_space<vmem>>, vector<2x128xf32>,
    return
  }
  func.func @transform_0(%arg0: i32) -> (i32, i32) {
    %c0_i32 = arith.constant 0 : i32
    %c0_i32_0 = arith.constant 0 : i32
    return %c0_i32, %arg0 : i32, i32
  }
  func.func @transform_1(%arg0: i32) -> (i32, i32) {
    %c0_i32 = arith.constant 0 : i32
    %c0_i32_0 = arith.constant 0 : i32
    %c0_i32_1 = arith.constant 0 : i32
    return %c0_i32, %c0_i32_0 : i32, i32
  }
  func.func @transform_2(%arg0: i32) -> (i32, i32) {
    %c0_i32 = arith.constant 0 : i32
    %c0_i32_0 = arith.constant 0 : i32
    %c0_i32_1 = arith.constant 0 : i32
    return %c0_i32, %c0_i32_0 : i32, i32
  }
  func.func @transform_3(%arg0: i32) -> (i32, i32) {
    %c0_i32 = arith.constant 0 : i32
    %c0_i32_0 = arith.constant 0 : i32
    %c0_i32_1 = arith.constant 0 : i32
    return %c0_i32, %c0_i32_0 : i32, i32
  }
  func.func @transform_4(%arg0: i32) -> (i32, i32) {
    %c0_i32 = arith.constant 0 : i32
    %c0_i32_0 = arith.constant 0 : i32
    %c0_i32_1 = arith.constant 0 : i32
    return %c0_i32, %c0_i32_0 : i32, i32
  }
  func.func @transform_5(%arg0: i32) -> (i32, i32) {
    %c0_i32 = arith.constant 0 : i32
    %c0_i32_0 = arith.constant 0 : i32
    %c0_i32_1 = arith.constant 0 : i32
    return %c0_i32, %c0_i32_0 : i32, i32
  }
  func.func @transform_6(%arg0: i32) -> (i32, i32) {
    %c0_i32 = arith.constant 0 : i32
    %c0_i32_0 = arith.constant 0 : i32
    %c0_i32_1 = arith.constant 0 : i32
    return %c0_i32, %c0_i32_0 : i32, i32
  }
  func.func @transform_7(%arg0: i32) -> (i32, i32) {
    %c0_i32 = arith.constant 0 : i32
    %c0_i32_0 = arith.constant 0 : i32
    return %c0_i32, %arg0 : i32, i32
  }
}

</mosaic_0001>

<bundles_post_ra>
// kernel: mlp_forward.1
= control target key start
LH: loop header
LB: loop body
LE: loop exit
PB: predicated region body
PF: predicated region fallthrough
CT: control target
= control target key end

     0   :  { %v314_v0 = vmov 0   ;;  %v315_v6 = vmov 1   ;;  %v316_v9 = vmov 2   ;;  %v317_v11 = vmov 0.0   ;;  %s409_s2 = inlined_call_operand.vmem [shape: f32[32,1], index: 2, kind: input, shape index: {}]   ;;  %s410_s1 = inlined_call_operand.vmem [shape: f32[32,3], index: 1, kind: input, shape index: {}]   ;;  %s411_s3 = inlined_call_operand.vmem [shape: bf16[16,32], index: 3, kind: input, shape index: {}]   ;;  %s412_s4 = inlined_call_operand.vmem [shape: f32[16,1], index: 4, kind: input, shape index: {}]   ;;  %s413_s0 = inlined_call_operand.vmem [shape: bf16[3,128], index: 0, kind: input, shape index: {}]   ;;  %s414_s6 = inlined_call_operand.vmem [shape: f32[2,1], index: 6, kind: input, shape index: {}]   ;;  %s415_s5 = inlined_call_operand.vmem [shape: bf16[2,16], index: 5, kind: input, shape index: {}]   ;;  %s416_s7 = inlined_call_operand.vmem [shape: f32[2,128], index: 7, kind: output, shape index: {}]  }
   0x1   :  { %302 = vset.pattern.permute.xlu1 %v314_v0  ;;  %301 = vset.pattern.permute.xlu0 %v314_v0  ;;  %v35_v1 = vld [vmem:[%s409_s2 + $0x10] sm:$0xff]  ;;  %v36_v3 = vld [vmem:[%s409_s2 + $0x18] sm:$0xff]  ;;  %v30_v5 = vld [vmem:[%s410_s1 + $0x8] sm:$0xff]  ;;  %vm318_vm0 = vmmov 0   ;;  %v57_v14 = vlaneseq  ;;  %vm170_vm1 = vcmask 261120   ;;  %vm225_vm2 = vcmask 130048  }
   0x2   :  { %v31_v2 = vld [vmem:[%s410_s1 + $0x10] sm:$0xff]  ;;  %77 = vperm.xlu1 %302, %v35_v1   ;;  %v32_v4 = vld [vmem:[%s410_s1 + $0x18] sm:$0xff]  ;;  %v33_v7 = vld [vmem:[%s409_s2] sm:$0xff]  ;;  %282 = vmatprep.subr.bf16.mxu0 %v317_v11 }
   0x3   :  { %49 = vperm.xlu0 %301, %v31_v2   ;;  %v29_v8 = vld [vmem:[%s410_s1] sm:$0xff]  ;;  %v34_v10 = vld [vmem:[%s409_s2 + $0x8] sm:$0xff]  ;;  %290 = vmatprep.subr.bf16.mxu1 %v317_v11  ;;  %v58_v17 = vshrl.u32 %v57_v14, 7 }
   0x4   :  { %286 = vmatprep.mubr.msk.bf16.mxu0 %vm318_vm0, %v317_v11  ;;  %292 = vmatprep.mubr.msk.bf16.mxu1 %vm318_vm0, %v317_v11  ;;  %v153_v12 = vld [vmem:[%s412_s4] sm:$0xff]  ;;  %v154_v13 = vld [vmem:[%s412_s4 + $0x8] sm:$0xff] }
   0x5   :  { %v27_v18 = vld [vmem:[%s413_s0] sm:$0x3]  ;;  %v59_v21 = vsub.s32 0, %v58_v17  ;;  %v107_v26 = vsub.s32 1, %v58_v17  ;;  %v135_v28 = vsub.s32 2, %v58_v17 }
   0x6   :  { %82 = vperm.xlu1 %302, %v36_v3   ;;  %v28_v22 = vunpack.c.l.bf16 %v27_v18 }
   0x7   :  { %54 = vperm.xlu0 %301, %v32_v4  }
   0x8   :  { %v60_v25 = vrot.slane %v28_v22, %v59_v21  ;;  %v108_v31 = vrot.slane %v28_v22, %v107_v26  ;;  %v136_v32 = vrot.slane %v28_v22, %v135_v28 }
   0xa   :  { %303 = vset.pattern.permute.xlu1 %v315_v6 }
   0xb   :  { %44 = vperm.xlu0 %301, %v30_v5   ;;  %102 = vperm.xlu1 %303, %v32_v4  }
   0xf   :  { %67 = vperm.xlu0 %301, %v33_v7   ;;  %304 = vset.pattern.permute.xlu1 %v314_v0  ;;  %v219_v7 = vld [vmem:[%s414_s6] sm:$0x3] }
  0x10   :  { %39 = vperm.xlu1 %304, %v29_v8  }
  0x13   :  { %306 = vset.pattern.permute.xlu0 %v315_v6 }
  0x14   :  { %98 = vperm.xlu0 %306, %v31_v2   ;;  %305 = vset.pattern.permute.xlu1 %v316_v9 }
  0x15   :  { %126 = vperm.xlu1 %305, %v31_v2  }
  0x18   :  { %90 = vperm.xlu0 %306, %v29_v8  }
  0x19   :  { %130 = vperm.xlu1 %305, %v32_v4  }
  0x1c   :  { %310 = vset.pattern.permute.xlu0 %v316_v9 }
  0x1d   :  { %122 = vperm.xlu0 %310, %v30_v5   ;;  %307 = vset.pattern.permute.xlu1 %v314_v0 }
  0x1e   :  { %72 = vperm.xlu1 %307, %v34_v10  }
  0x21   :  { %312 = vset.pattern.permute.xlu0 %v314_v0 }
  0x22   :  { %308 = vset.pattern.permute.xlu1 %v315_v6  ;;  %v313_v6 = vld [vmem:[%s411_s3] sm:$0xff]   ;;  %222 = vperm.xlu0 %312, %v219_v7  }
  0x23   :  { %94 = vperm.xlu1 %308, %v30_v5  }
  0x27   :  { %309 = vset.pattern.permute.xlu1 %v316_v9 }
  0x28   :  { %118 = vperm.xlu1 %309, %v29_v8  }
  0x2c   :  { %311 = vset.pattern.permute.xlu1 %v314_v0 }
  0x2d   :  { %157 = vperm.xlu1 %311, %v153_v12  }
  0x31   :  { %162 = vperm.xlu1 %311, %v154_v13  }
  0x7d   :  { %v78_v15 = vpop.permute.xlu1 %77 }
  0x7e   :  { %v50_v16 = vpop.permute.xlu0 %49 }
  0x7f   :  { %v63_v29 = vmul.f32 %v60_v25, %v50_v16 }
  0x81   :  { %v83_v19 = vpop.permute.xlu1 %82  ;;  %v87_v34 = vadd.f32 %v78_v15, %v63_v29 }
  0x82   :  { %v55_v20 = vpop.permute.xlu0 %54 }
  0x83   :  { %v64_v35 = vmul.f32 %v60_v25, %v55_v20 }
  0x85   :  { %v88_v41 = vadd.f32 %v83_v19, %v64_v35  ;;  %v217_v19 = vld [vmem:[%s415_s5] sm:$0x1] }
  0x86   :  { %v45_v23 = vpop.permute.xlu0 %44  ;;  %v103_v24 = vpop.permute.xlu1 %102 }
  0x87   :  { %v112_v38 = vmul.f32 %v108_v31, %v103_v24  ;;  %v62_v52 = vmul.f32 %v60_v25, %v45_v23 }
  0x89   :  { %v116_v43 = vadd.f32 %v112_v38, %v88_v41 }
  0x8a   :  { %v68_v27 = vpop.permute.xlu0 %67 }
  0x8b   :  { %v40_v30 = vpop.permute.xlu1 %39 }
  0x8c   :  { %v61_v54 = vmul.f32 %v60_v25, %v40_v30 }
  0x8e   :  { %v85_v61 = vadd.f32 %v68_v27, %v61_v54 }
  0x8f   :  { %v99_v33 = vpop.permute.xlu0 %98 }
  0x90   :  { %v111_v36 = vmul.f32 %v108_v31, %v99_v33  ;;  %v127_v37 = vpop.permute.xlu1 %126 }
  0x91   :  { %v139_v40 = vmul.f32 %v136_v32, %v127_v37 }
  0x92   :  { %v115_v39 = vadd.f32 %v111_v36, %v87_v34 }
  0x93   :  { %v91_v48 = vpop.permute.xlu0 %90 }
  0x94   :  { %v131_v42 = vpop.permute.xlu1 %130  ;;  %v143_v44 = vadd.f32 %v139_v40, %v115_v39  ;;  %v109_v58 = vmul.f32 %v108_v31, %v91_v48 }
  0x95   :  { %v140_v45 = vmul.f32 %v136_v32, %v131_v42 }
  0x96   :  { %v147_v47 = vmax.f32 %v143_v44, 0.0  ;;  %v113_v63 = vadd.f32 %v109_v58, %v85_v61 }
  0x97   :  { %v144_v46 = vadd.f32 %v140_v45, %v116_v43 }
  0x98   :  { %v123_v53 = vpop.permute.xlu0 %122 }
  0x99   :  { %v148_v49 = vmax.f32 %v144_v46, 0.0  ;;  %v73_v50 = vpop.permute.xlu1 %72  ;;  %v138_v59 = vmul.f32 %v136_v32, %v123_v53 }
  0x9a   :  { %v86_v56 = vadd.f32 %v73_v50, %v62_v52 }
  0x9b   :  { %v152_v51 = vpack.c.bf16 %v148_v49, %v147_v47 }
  0x9d   :  { %283 = vmatpush3.bf16.msra.mxu0 %v152_v51  ;;  %v223_v20 = vpop.permute.xlu0 %222 }
  0x9e   :  { %v95_v55 = vpop.permute.xlu1 %94  ;;  %284 = vmatprep.subr.bf16.mxu0 %v317_v11 }
  0x9f   :  { %v110_v57 = vmul.f32 %v108_v31, %v95_v55 }
  0xa1   :  { %v114_v60 = vadd.f32 %v110_v57, %v86_v56 }
  0xa3   :  { %v119_v62 = vpop.permute.xlu1 %118  ;;  %v142_v0 = vadd.f32 %v138_v59, %v114_v60 }
  0xa4   :  { %v137_v1 = vmul.f32 %v136_v32, %v119_v62 }
  0xa5   :  { %v146_v3 = vmax.f32 %v142_v0, 0.0 }
  0xa6   :  { %v141_v2 = vadd.f32 %v137_v1, %v113_v63 }
  0xa8   :  { %v145_v4 = vmax.f32 %v141_v2, 0.0  ;;  %v158_v8 = vpop.permute.xlu1 %157 }
  0xaa   :  { %v151_v5 = vpack.c.bf16 %v146_v3, %v145_v4 }
  0xac   :  { %285 = vmatpush3.bf16.msra.mxu0 %v151_v5  ;;  %v163_v12 = vpop.permute.xlu1 %162 }
  0xaf   :  { %287 = vmatmul.mubr.msk.bf16.vlgmr.msra.gmra.mxu0 %vm170_vm1, %v313_v6 }
 0x16f   :  { %v208_v9 = vpop.f32.mrf.mxu0 }
 0x170   :  { %v209_v11 = vadd.f32 %v208_v9, %v158_v8 }
 0x171   :  { %v288_v10 = vpop.f32.mrf.mxu0 }
 0x172   :  { %v215_v16 = vmax.f32 %v209_v11, 0.0 }
 0x173   :  { %v211_v13 = vpop.f32.mrf.mxu0 }
 0x174   :  { %v212_v14 = vadd.f32 %v211_v13, %v163_v12 }
 0x175   :  { %v289_v15 = vpop.f32.mrf.mxu0 }
 0x176   :  { %v216_v17 = vmax.f32 %v212_v14, 0.0 }
 0x178   :  { %v218_v18 = vpack.c.bf16 %v216_v17, %v215_v16 }
 0x17a   :  { %291 = vmatpush3.bf16.msra.mxu1 %v218_v18 }
 0x17d   :  { %293 = vmatmul.mubr.msk.bf16.vlgmr.msra.gmra.mxu1 %vm225_vm2, %v217_v19 }
 0x23d   :  { %v263_v21 = vpop.f32.mrf.mxu1 }
 0x23e   :  { %v264_v22 = vadd.f32 %v263_v21, %v223_v20 }
 0x23f   :  { %v294_v23 = vpop.f32.mrf.mxu1 }
 0x240   :  { %269 = vst [vmem:[%s416_s7] sm:$0x3] %v264_v22 }
 0x241   :  { %v266_v24 = vpop.f32.mrf.mxu1 }
 0x243   :  { %v295_v25 = vpop.f32.mrf.mxu1 }

</bundles_post_ra>
